<compile_context>
chip_gen: v7x
topology: tpu7x:2x2x1
jax: 0.10.0
libtpu: 0.0.40
codegen_flags: <defaults>
</compile_context>

<pallas_src>
import functools
import math

import jax
import jax.numpy as jnp
from jax.experimental import pallas as pl
from jax.experimental.pallas import tpu as pltpu

_LANES = 128


def _layernorm_kernel(x_ref, w_ref, b_ref, o_ref, *, eps, inv_h):
    """Standard path: normalize each row of a (block_rows, hidden) tile."""
    x = x_ref[...].astype(jnp.float32)
    u = jnp.sum(x, axis=-1, keepdims=True) * inv_h
    xc = x - u
    s = jnp.sum(xc * xc, axis=-1, keepdims=True) * inv_h
    inv = jax.lax.rsqrt(s + eps)
    w = w_ref[...].astype(jnp.float32)
    b = b_ref[...].astype(jnp.float32)
    o_ref[...] = (xc * (inv * w) + b).astype(o_ref.dtype)


def _layernorm_folded_kernel(x_ref, s_ref, w_ref, b_ref, o_ref, *, eps, inv_h):
    """Lane-dense path for hidden < 128: k = 128 // hidden logical rows are
    folded into the 128-lane axis.  Per-segment mean/var use two MXU matmuls
    against the constant block-diagonal 0/1 matrix S, which both sums a lane
    segment and broadcasts the statistic back to every lane of that segment
    (MXU is otherwise idle; keeps VPU/XLU slots free for the mem-bound stream)."""
    x = x_ref[...].astype(jnp.float32)                       # (B, 128)
    S = s_ref[...]                                           # (128, 128) f32 0/1
    u = jnp.dot(x, S, preferred_element_type=jnp.float32) * inv_h
    xc = x - u
    var = jnp.dot(xc * xc, S, preferred_element_type=jnp.float32) * inv_h
    inv = jax.lax.rsqrt(var + eps)
    w = w_ref[...].astype(jnp.float32)                       # weight tiled k times
    b = b_ref[...].astype(jnp.float32)
    o_ref[...] = (xc * (inv * w) + b).astype(o_ref.dtype)


def _sublane_multiple(itemsize):
    """Dtype-native sublane tile: 8 rows (4B), 16 rows (2B), 32 rows (1B)."""
    return max(8, 32 // max(1, int(itemsize)))


def _pick_block_rows(kern_rows, kern_cols, itemsize, folded):
    """Row tile from a per-block bytes target plus a generation-aware VMEM budget."""
    try:
        vmem_bytes = int(pltpu.get_tpu_info().vmem_capacity_bytes)
    except Exception:
        vmem_bytes = 64 * 1024 * 1024            # conservative: v7x per-TensorCore

    if vmem_bytes <= 64 * 1024 * 1024:
        # v7x-class: 64 MiB physical. ~3 MiB input blocks, live set <= ~44 MiB,
        # ~6 MiB headroom for Mosaic internal scratch / spills.
        target_block_bytes = 3 * 1024 * 1024
        live_budget = 44 * 1024 * 1024
        vmem_limit = vmem_bytes - 6 * 1024 * 1024
    else:
        # v5e/v6e-class: 128 MiB physical. ~6 MiB blocks already sit on the HBM
        # roofline; keep the 100 MiB scoped limit.
        target_block_bytes = 6 * 1024 * 1024
        live_budget = vmem_bytes // 2
        vmem_limit = 100 * 1024 * 1024

    # Live bytes per block row: double-buffered input + output (in x.dtype) plus
    # the kernel body's f32 temporaries (more for the folded/matmul variant).
    n_f32_temps = 5 if folded else 4
    per_row_live = kern_cols * (4 * itemsize + n_f32_temps * 4)
    per_row_block = kern_cols * itemsize

    br_target = target_block_bytes // max(1, per_row_block)
    br_budget = (live_budget - (1 << 20)) // max(1, per_row_live)   # 1 MiB for S/w/b
    br = max(1, min(int(br_target), int(br_budget)))

    sub = _sublane_multiple(itemsize)
    br = max(sub, (br // sub) * sub)
    if br >= kern_rows:
        br = kern_rows                           # single block; full dim satisfies tiling rule
    return br, int(vmem_limit)


def layer_norm(x, weight, bias, eps=1e-12, block_rows=None):
    """TF-style LayerNorm over the last axis of x. weight/bias: (hidden,)."""
    orig_shape = x.shape
    hidden = orig_shape[-1]
    rows = math.prod(orig_shape[:-1]) if len(orig_shape) > 1 else 1
    x2 = x.reshape(rows, hidden)

    fold = (hidden < _LANES) and (_LANES % hidden == 0)
    if fold:
        k = _LANES // hidden
        pad_rows = (-rows) % k
        if pad_rows:
            # <k zero rows so the free row-major refold applies: keeps the
            # lane-dense path for ragged row counts; padded rows are sliced off.
            x2 = jnp.pad(x2, ((0, pad_rows), (0, 0)))
        kern_rows, kern_cols = (rows + pad_rows) // k, _LANES
        x2 = x2.reshape(kern_rows, kern_cols)                # free row-major refold
        seg = jnp.arange(_LANES, dtype=jnp.int32) // hidden
        S = (seg[:, None] == seg[None, :]).astype(jnp.float32)   # block-diag segment sum
        w2 = jnp.tile(weight.reshape(1, hidden), (1, k))
        b2 = jnp.tile(bias.reshape(1, hidden), (1, k))
        kernel = functools.partial(_layernorm_folded_kernel, eps=float(eps),
                                   inv_h=1.0 / hidden)
        inputs = [x2, S, w2, b2]
    else:
        pad_rows = 0
        kern_rows, kern_cols = rows, hidden
        w2 = weight.reshape(1, hidden)
        b2 = bias.reshape(1, hidden)
        kernel = functools.partial(_layernorm_kernel, eps=float(eps),
                                   inv_h=1.0 / hidden)
        inputs = [x2, w2, b2]

    itemsize = jnp.dtype(x.dtype).itemsize
    sub = _sublane_multiple(itemsize)
    auto_rows, vmem_limit = _pick_block_rows(kern_rows, kern_cols, itemsize, fold)
    if block_rows is None:
        block_rows = auto_rows
    block_rows = min(int(block_rows), kern_rows)
    if block_rows < kern_rows:
        block_rows = max(sub, (block_rows // sub) * sub)     # dtype-native sublane tile

    # Ragged last block is handled by Pallas (per-row stats -> padded rows can't
    # contaminate valid rows; OOB writes are dropped).
    grid = (pl.cdiv(kern_rows, block_rows),)

    x_spec = pl.BlockSpec((block_rows, kern_cols), lambda i: (i, 0))
    vec_spec = pl.BlockSpec((1, kern_cols), lambda i: (0, 0))
    if fold:
        in_specs = [x_spec,
                    pl.BlockSpec((_LANES, _LANES), lambda i: (0, 0)),
                    vec_spec, vec_spec]
    else:
        in_specs = [x_spec, vec_spec, vec_spec]

    # Note: pipeline_mode=pl.Buffered(3) on x_spec is a further option on v7x if
    # a trace still shows exposed DMA at these block sizes; default depth kept.
    out = pl.pallas_call(
        kernel,
        out_shape=jax.ShapeDtypeStruct((kern_rows, kern_cols), x.dtype),
        grid_spec=pltpu.PrefetchScalarGridSpec(
            num_scalar_prefetch=0,
            grid=grid,
            in_specs=in_specs,
            out_specs=pl.BlockSpec((block_rows, kern_cols), lambda i: (i, 0)),
        ),
        compiler_params=pltpu.CompilerParams(
            dimension_semantics=("parallel",),
            vmem_limit_bytes=vmem_limit,
        ),
    )(*inputs)

    if fold and pad_rows:
        out = out.reshape(-1, hidden)[:rows]
    return out.reshape(orig_shape)


if __name__ == "__main__":
    key = jax.random.PRNGKey(0)
    kx, kw, kb, k3, k4, k5, k6 = jax.random.split(key, 7)

    def ref_ln(x, w, b, eps=1e-12):
        x32 = x.astype(jnp.float32)
        u = jnp.mean(x32, axis=-1, keepdims=True)
        s = jnp.mean((x32 - u) ** 2, axis=-1, keepdims=True)
        y = w.astype(jnp.float32) * ((x32 - u) / jnp.sqrt(s + eps)) + b.astype(jnp.float32)
        return y.astype(x.dtype)

    batch, seq, hidden = 2, 8, 32
    x = jax.random.normal(kx, (batch, seq, hidden), dtype=jnp.float32)

    # 1) Default nn.Parameter init (ones/zeros), matching the PyTorch module.
    #    Folded path uses MXU segment-sum matmuls; tolerance covers a possible
    #    reduced-precision f32 matmul lowering (exact-f32 path error is ~1e-6).
    w1 = jnp.ones((hidden,), jnp.float32)
    b1 = jnp.zeros((hidden,), jnp.float32)
    y1 = jax.block_until_ready(layer_norm(x, w1, b1, eps=1e-12))
    assert jnp.allclose(y1, ref_ln(x, w1, b1), atol=5e-3, rtol=5e-3), "mismatch: folded ones/zeros"

    # 2) Non-trivial affine params exercise the lane-folded weight/bias tiling.
    w2 = jax.random.normal(kw, (hidden,), dtype=jnp.float32)
    b2 = jax.random.normal(kb, (hidden,), dtype=jnp.float32)
    y2 = jax.block_until_ready(layer_norm(x, w2, b2, eps=1e-12))
    assert jnp.allclose(y2, ref_ln(x, w2, b2), atol=5e-3, rtol=5e-3), "mismatch: folded random w/b"

    # 3) rows % k != 0: padded lane-dense path (fold condition relaxed).
    x3 = jax.random.normal(k3, (3, 7, hidden), dtype=jnp.float32)
    y3 = jax.block_until_ready(layer_norm(x3, w2, b2))
    assert jnp.allclose(y3, ref_ln(x3, w2, b2), atol=5e-3, rtol=5e-3), "mismatch: ragged fold"

    # 4) kern_rows % block_rows != 0: ragged last grid block masked by Pallas.
    x4 = jax.random.normal(k4, (5, 8, hidden), dtype=jnp.float32)
    y4 = jax.block_until_ready(layer_norm(x4, w2, b2, block_rows=8))
    assert jnp.allclose(y4, ref_ln(x4, w2, b2), atol=5e-3, rtol=5e-3), "mismatch: ragged last block"

    # 5) hidden >= 128: standard (non-folded) kernel path, strict tolerance.
    h5 = 256
    x5 = jax.random.normal(k5, (2, 4, h5), dtype=jnp.float32)
    w5 = jax.random.normal(kw, (h5,), dtype=jnp.float32)
    b5 = jax.random.normal(kb, (h5,), dtype=jnp.float32)
    y5 = jax.block_until_ready(layer_norm(x5, w5, b5))
    assert jnp.allclose(y5, ref_ln(x5, w5, b5), atol=1e-5, rtol=1e-5), "mismatch: standard path"

    # 6) bf16 inputs (dtype-aware sublane alignment path), loose bf16 tolerance.
    x6 = jax.random.normal(k6, (4, 8, hidden), dtype=jnp.float32).astype(jnp.bfloat16)
    w6 = w2.astype(jnp.bfloat16)
    b6 = b2.astype(jnp.bfloat16)
    y6 = jax.block_until_ready(layer_norm(x6, w6, b6))
    assert jnp.allclose(y6.astype(jnp.float32), ref_ln(x6, w6, b6).astype(jnp.float32),
                        atol=5e-2, rtol=5e-2), "mismatch: bf16 folded"

    print("KERNEL_OK")
</pallas_src>

<mosaic_0001>
module attributes {stable_mosaic.version = 11 : i64} {
  func.func @_layernorm_folded_kernel(%arg0: i32, %arg1: memref<4x128xf32, #tpu.memory_space<vmem>>, %arg2: memref<128x128xf32, #tpu.memory_space<vmem>>, %arg3: memref<1x128xf32, #tpu.memory_space<vmem>>, %arg4: memref<1x128xf32, #tpu.memory_space<vmem>>, %arg5: memref<4x128xf32, #tpu.memory_space<vmem>>) attributes {dimension_semantics = [#tpu.dimension_semantics<parallel>], iteration_bounds = array<i64: 1>, scalar_prefetch = 0 : i64, scratch_operands = 0 : i64, tpu.core_type = #tpu.core_type<tc>, window_params = [{transform_indices = @transform_0, window_bounds = array<i64: 4, 128>}, {pipeline_mode = #tpu.pipeline_mode<synchronous>, transform_indices = @transform_1, window_bounds = array<i64: 128, 128>}, {pipeline_mode = #tpu.pipeline_mode<synchronous>, transform_indices = @transform_2, window_bounds = array<i64: 1, 128>}, {pipeline_mode = #tpu.pipeline_mode<synchronous>, transform_indices = @transform_3, window_bounds = array<i64: 1, 128>}, {transform_indices = @transform_4, window_bounds = array<i64: 4, 128>}]} {
    %c0 = arith.constant 0 : index
    %c0_0 = arith.constant 0 : index
    %0 = vector.load %arg1[%c0, %c0_0] : memref<4x128xf32, #tpu.memory_space<vmem>>, vector<4x128xf32>
    %c0_1 = arith.constant 0 : index
    %c0_2 = arith.constant 0 : index
    %1 = vector.load %arg2[%c0_1, %c0_2] : memref<128x128xf32, #tpu.memory_space<vmem>>, vector<128x128xf32>
    %cst = arith.constant dense<0.000000e+00> : vector<4x128xf32>
    %2 = tpu.matmul %0, %1, %cst {dimension_numbers = #tpu.dot_dimension_numbers<[1], [0], [0], [1], [0, 0, 1, 1], [], []>} : vector<4x128xf32>, vector<128x128xf32>, vector<4x128xf32> -> vector<4x128xf32>
    %cst_3 = arith.constant 3.125000e-02 : f32
    %3 = vector.broadcast %cst_3 : f32 to vector<4x128xf32>
    %4 = arith.mulf %2, %3 : vector<4x128xf32>
    %5 = arith.subf %0, %4 : vector<4x128xf32>
    %6 = arith.mulf %5, %5 : vector<4x128xf32>
    %cst_4 = arith.constant dense<0.000000e+00> : vector<4x128xf32>
    %7 = tpu.matmul %6, %1, %cst_4 {dimension_numbers = #tpu.dot_dimension_numbers<[1], [0], [0], [1], [0, 0, 1, 1], [], []>} : vector<4x128xf32>, vector<128x128xf32>, vector<4x128xf32> -> vector<4x128xf32>
    %cst_5 = arith.constant 3.125000e-02 : f32
    %8 = vector.broadcast %cst_5 : f32 to vector<4x128xf32>
    %9 = arith.mulf %7, %8 : vector<4x128xf32>
    %cst_6 = arith.constant 9.99999996E-13 : f32
    %10 = vector.broadcast %cst_6 : f32 to vector<4x128xf32>
    %11 = arith.addf %9, %10 : vector<4x128xf32>
    %12 = math.rsqrt %11 : vector<4x128xf32>
    %c0_7 = arith.constant 0 : index
    %c0_8 = arith.constant 0 : index
    %13 = vector.load %arg3[%c0_7, %c0_8] : memref<1x128xf32, #tpu.memory_space<vmem>>, vector<1x128xf32>
    %c0_9 = arith.constant 0 : index
    %c0_10 = arith.constant 0 : index
    %14 = vector.load %arg4[%c0_9, %c0_10] : memref<1x128xf32, #tpu.memory_space<vmem>>, vector<1x128xf32>
    %15 = vector.broadcast %13 : vector<1x128xf32> to vector<4x128xf32>
    %16 = arith.mulf %12, %15 : vector<4x128xf32>
    %17 = arith.mulf %5, %16 : vector<4x128xf32>
    %18 = vector.broadcast %14 : vector<1x128xf32> to vector<4x128xf32>
    %19 = arith.addf %17, %18 : vector<4x128xf32>
    %c0_11 = arith.constant 0 : index
    %c0_12 = arith.constant 0 : index
    %20 = vector.load %arg5[%c0_11, %c0_12] : memref<4x128xf32, #tpu.memory_space<vmem>>, vector<4x128xf32>
    tpu.vector_store %arg5[%c0_11, %c0_12], %19 {strides = array<i32>} : memref<4x128xf32, #tpu.memory_space<vmem>>, vector<4x128xf32>,
    return
  }
  func.func @transform_0(%arg0: i32) -> (i32, i32) {
    %c0_i32 = arith.constant 0 : i32
    %c0_i32_0 = arith.constant 0 : i32
    return %arg0, %c0_i32 : i32, i32
  }
  func.func @transform_1(%arg0: i32) -> (i32, i32) {
    %c0_i32 = arith.constant 0 : i32
    %c0_i32_0 = arith.constant 0 : i32
    %c0_i32_1 = arith.constant 0 : i32
    return %c0_i32, %c0_i32_0 : i32, i32
  }
  func.func @transform_2(%arg0: i32) -> (i32, i32) {
    %c0_i32 = arith.constant 0 : i32
    %c0_i32_0 = arith.constant 0 : i32
    %c0_i32_1 = arith.constant 0 : i32
    return %c0_i32, %c0_i32_0 : i32, i32
  }
  func.func @transform_3(%arg0: i32) -> (i32, i32) {
    %c0_i32 = arith.constant 0 : i32
    %c0_i32_0 = arith.constant 0 : i32
    %c0_i32_1 = arith.constant 0 : i32
    return %c0_i32, %c0_i32_0 : i32, i32
  }
  func.func @transform_4(%arg0: i32) -> (i32, i32) {
    %c0_i32 = arith.constant 0 : i32
    %c0_i32_0 = arith.constant 0 : i32
    return %arg0, %c0_i32 : i32, i32
  }
}

</mosaic_0001>

<bundles_post_ra>
// kernel: tpu_custom_call.1
= control target key start
LH: loop header
LB: loop body
LE: loop exit
PB: predicated region body
PF: predicated region fallthrough
CT: control target
= control target key end

     0   :  { %9 = vsyncpa [#allocation3], 0  ;;  %s559_s0 = inlined_call_operand.hbm [shape: f32[4,128], index: 0, kind: input, shape index: {}]   ;;  %s560_s1 = inlined_call_operand.hbm [shape: f32[128,128], index: 1, kind: input, shape index: {}]   ;;  %s561_s2 = inlined_call_operand.vmem [shape: f32[1,128], index: 2, kind: input, shape index: {}]   ;;  %s562_s3 = inlined_call_operand.vmem [shape: f32[1,128], index: 3, kind: input, shape index: {}]   ;;  %s563_s4 = inlined_call_operand.hbm [shape: f32[4,128], index: 4, kind: output, shape index: {}]  }
   0x1   :  { %10 = vsyncpa [#allocation6], 0 }
   0x2   :  { %11 = vsyncpa [#allocation4], 0  ;;  %s477_s15 = smov [#allocation2]   ;;  %s478_s17 = smov [#allocation5]  }
   0x3   :  { %s18_s16 = sshll.u32 %s477_s15, 4  ;;  %s27_s18 = sshll.u32 %s478_s17, 4  ;;  %s19_s16 = int_to_ptr.vmem [resolvable:$true] %s18_s16  ;;  %s510_s18 = int_to_ptr.vmem [resolvable:$true] %s27_s18 }
   0x4   :  { %s405_s21 = scalar_lea.hbm %s559_s0, 64 }
   0x5   :  { %p406_p0 = scmp.ne.s32.totalorder %s559_s0, %s405_s21  ;;  %p409_p1 = scmp.lt.u32.totalorder %s405_s21, %s559_s0 }
   0x7   :  { %p411_p2 = pnand %p409_p1, %p406_p0 }
   0x9   :  { %414 = shalt.err (!%p411_p2)
}
   0xa   :  { %s415_s26 = scalar_lea.vmem %s19_s16, 64  ;;  %p420_p4 = scmp.lt.s32.totalorder %s19_s16, %s19_s16 }
   0xb   :  { %p416_p3 = scmp.ne.s32.totalorder %s19_s16, %s415_s26  ;;  %p421_p5 = scmp.lt.s32.totalorder %s415_s26, %s415_s26 }
   0xd   :  { %p422_p6 = por %p421_p5, %p420_p4 }
   0xf   :  { %p423_p7 = pnand %p422_p6, %p416_p3 }
  0x11   :  { %426 = shalt.err (!%p423_p7)
}
  0x12   :  { %21 = dma.hbm_to_vmem [thread:$0]  %s559_s0, 64, %s19_s16, [#allocation3]  }
  0x13   :  { %s427_s5 = scalar_lea.hbm %s560_s1, 2048 }
  0x14   :  { %p428_p8 = scmp.ne.s32.totalorder %s560_s1, %s427_s5  ;;  %p431_p9 = scmp.lt.u32.totalorder %s427_s5, %s560_s1 }
  0x16   :  { %p433_p10 = pnand %p431_p9, %p428_p8 }
  0x18   :  { %436 = shalt.err (!%p433_p10)
}
  0x19   :  { %s437_s10 = scalar_lea.vmem %s510_s18, 2048  ;;  %p442_p12 = scmp.lt.s32.totalorder %s510_s18, %s510_s18 }
  0x1a   :  { %p438_p11 = scmp.ne.s32.totalorder %s510_s18, %s437_s10  ;;  %p443_p13 = scmp.lt.s32.totalorder %s437_s10, %s437_s10 }
  0x1c   :  { %p444_p0 = por %p443_p13, %p442_p12 }
  0x1e   :  { %p445_p1 = pnand %p444_p0, %p438_p11 }
  0x20   :  { %448 = shalt.err (!%p445_p1)
}
  0x21   :  { %s479_s0 = smov 128   ;;  %s480_s11 = smov 8  }
  0x22   :  { %33 = dma.hbm_to_vmem [thread:$0]  %s560_s1, 2048, %s510_s18, [#allocation6], %s479_s0, %s479_s0, %s480_s11  }
  0x23   :  { %471 = dma.done.wait [#allocation3], 64  }
  0x24   :  { %472 = vsyncadd [#allocation3], 4294967232 }
  0x25   :  { %473 = dma.done.wait [#allocation6], 2048  }
  0x26   :  { %474 = vsyncadd [#allocation6], 4294965248  ;;  %v481_v0 = vmov 0.0|0.0   ;;  %vm482_vm0 = vmmov 0   ;;  %v483_v1 = vmov 0.0   ;;  %v45_v2 = vld [vmem:[#allocation5] sm:$0xff] }
  0x27   :  { %347 = vmatprep.subr.bf16.mxu0 %v481_v0  ;;  %309 = vmatprep.mubr.msk.f32.mxu0 %vm482_vm0, %v483_v1  ;;  %v46_v3 = vld [vmem:[#allocation5 + $0x8] sm:$0xff]  ;;  %v47_v4 = vld [vmem:[#allocation5 + $0x10] sm:$0xff]  ;;  %v48_v6 = vld [vmem:[#allocation5 + $0x18] sm:$0xff]  ;;  %s484_s17 = smov [#allocation7]  }
  0x28   :  { %371 = vmatprep.subr.bf16.mxu1 %v481_v0  ;;  %344 = vmatprep.mubr.msk.f32.mxu1 %vm482_vm0, %v483_v1  ;;  %v348_v5 = vpack.c.bf16 %v46_v3, %v45_v2  ;;  %v351_v7 = vpack.c.bf16 %v48_v6, %v47_v4  ;;  %v49_v8 = vld [vmem:[#allocation5 + $0x20] sm:$0xff]  ;;  %v50_v9 = vld [vmem:[#allocation5 + $0x28] sm:$0xff]  ;;  %v51_v11 = vld [vmem:[#allocation5 + $0x30] sm:$0xff]  ;;  %s231_s18 = sshll.u32 %s484_s17, 4  ;;  %s232_s18 = int_to_ptr.vmem [resolvable:$true] %s231_s18 }
  0x29   :  { %v354_v10 = vpack.c.bf16 %v50_v9, %v49_v8  ;;  %v52_v12 = vld [vmem:[#allocation5 + $0x38] sm:$0xff]  ;;  %v53_v14 = vld [vmem:[#allocation5 + $0x40] sm:$0xff]  ;;  %v54_v15 = vld [vmem:[#allocation5 + $0x48] sm:$0xff]  ;;  %s449_s19 = scalar_lea.vmem %s232_s18, 64  ;;  %p454_p3 = scmp.lt.s32.totalorder %s232_s18, %s232_s18 }
  0x2a   :  { %349 = vmatpush3.bf16.msra.mxu0 %v348_v5  ;;  %373 = vmatpush3.bf16.msra.mxu1 %v348_v5  ;;  %v357_v13 = vpack.c.bf16 %v52_v12, %v51_v11  ;;  %v360_v16 = vpack.c.bf16 %v54_v15, %v53_v14  ;;  %v55_v17 = vld [vmem:[#allocation5 + $0x50] sm:$0xff]  ;;  %v56_v18 = vld [vmem:[#allocation5 + $0x58] sm:$0xff]  ;;  %v57_v20 = vld [vmem:[#allocation5 + $0x60] sm:$0xff]  ;;  %p450_p2 = scmp.ne.s32.totalorder %s232_s18, %s449_s19  ;;  %p455_p4 = scmp.lt.s32.totalorder %s449_s19, %s449_s19 }
  0x2b   :  { %350 = vmatprep.subr.bf16.mxu0 %v481_v0  ;;  %374 = vmatprep.subr.bf16.mxu1 %v481_v0  ;;  %v363_v19 = vpack.c.bf16 %v56_v18, %v55_v17  ;;  %v58_v21 = vld [vmem:[#allocation5 + $0x68] sm:$0xff]  ;;  %v59_v23 = vld [vmem:[#allocation5 + $0x70] sm:$0xff]  ;;  %v60_v24 = vld [vmem:[#allocation5 + $0x78] sm:$0xff] }
  0x2c   :  { %v366_v22 = vpack.c.bf16 %v58_v21, %v57_v20  ;;  %v369_v25 = vpack.c.bf16 %v60_v24, %v59_v23  ;;  %v44_v26 = vld [vmem:[#allocation2] sm:$0xf]  ;;  %p456_p5 = por %p455_p4, %p454_p3 }
  0x2d   :  { %v241_v36 = vld [vmem:[%s561_s2] ss:$0 sm:$0xff] }
  0x2e   :  { %352 = vmatpush3.bf16.msra.mxu0 %v351_v7  ;;  %376 = vmatpush3.bf16.msra.mxu1 %v351_v7  ;;  %v242_v39 = vld [vmem:[%s562_s3] ss:$0 sm:$0xff]  ;;  %p457_p6 = pnand %p456_p5, %p450_p2 }
  0x2f   :  { %353 = vmatprep.subr.bf16.mxu0 %v481_v0  ;;  %377 = vmatprep.subr.bf16.mxu1 %v481_v0 }
  0x32   :  { %355 = vmatpush3.bf16.msra.mxu0 %v354_v10  ;;  %379 = vmatpush3.bf16.msra.mxu1 %v354_v10 }
  0x33   :  { %356 = vmatprep.subr.bf16.mxu0 %v481_v0  ;;  %380 = vmatprep.subr.bf16.mxu1 %v481_v0 }
  0x36   :  { %358 = vmatpush3.bf16.msra.mxu0 %v357_v13  ;;  %382 = vmatpush3.bf16.msra.mxu1 %v357_v13 }
  0x37   :  { %359 = vmatprep.subr.bf16.mxu0 %v481_v0  ;;  %383 = vmatprep.subr.bf16.mxu1 %v481_v0 }
  0x3a   :  { %361 = vmatpush3.bf16.msra.mxu0 %v360_v16  ;;  %385 = vmatpush3.bf16.msra.mxu1 %v360_v16 }
  0x3b   :  { %362 = vmatprep.subr.bf16.mxu0 %v481_v0  ;;  %386 = vmatprep.subr.bf16.mxu1 %v481_v0 }
  0x3e   :  { %364 = vmatpush3.bf16.msra.mxu0 %v363_v19  ;;  %388 = vmatpush3.bf16.msra.mxu1 %v363_v19 }
  0x3f   :  { %365 = vmatprep.subr.bf16.mxu0 %v481_v0  ;;  %389 = vmatprep.subr.bf16.mxu1 %v481_v0 }
  0x42   :  { %367 = vmatpush3.bf16.msra.mxu0 %v366_v22  ;;  %391 = vmatpush3.bf16.msra.mxu1 %v366_v22 }
  0x43   :  { %368 = vmatprep.subr.bf16.mxu0 %v481_v0  ;;  %392 = vmatprep.subr.bf16.mxu1 %v481_v0 }
  0x46   :  { %370 = vmatpush3.bf16.msra.mxu0 %v369_v25  ;;  %394 = vmatpush3.bf16.msra.mxu1 %v369_v25 }
  0x49   :  { %310 = vmatmul.mubr.f32.vlgmr.msra.gmra.mrb[0].mxu0 %v44_v26 }
 0x11c   :  { %v127_v27 = vpop.f32.mrb[0].mxu0 }
 0x11d   :  { %v131_v28 = vmul.f32 0.03125, %v127_v27  ;;  %v311_v29 = vpop.f32.mrb[1].mxu0 }
 0x11f   :  { %v132_v30 = vsub.f32 %v44_v26, %v131_v28 }
 0x121   :  { %v133_v31 = vmul.f32 %v132_v30, %v132_v30 }
 0x123   :  { %345 = vmatmul.mubr.f32.vlgmr.msra.gmra.mrb[0].mxu1 %v133_v31 }
 0x1f6   :  { %v200_v32 = vpop.f32.mrb[0].mxu1 }
 0x1f7   :  { %v204_v33 = vmul.f32 0.03125, %v200_v32  ;;  %v346_v34 = vpop.f32.mrb[1].mxu1 }
 0x1f9   :  { %v205_v35 = vadd.f32 1e-12, %v204_v33 }
 0x1fb   :  { %403 = vrsqrt.f32 %v205_v35 }
 0x205   :  { %v404_v37 = vpop.eup %403 }
 0x206   :  { %v215_v38 = vmul.f32 %v404_v37, %v241_v36 }
 0x208   :  { %v216_v40 = vmul.f32 %v215_v38, %v132_v30 }
 0x20a   :  { %v223_v41 = vadd.f32 %v242_v39, %v216_v40 }
 0x20c   :  { %224 = vst [vmem:[#allocation7] sm:$0xf] %v223_v41 }
 0x20d   :  { %460 = shalt.err (!%p457_p6)
}
 0x20e   :  { %s461_s21 = scalar_lea.hbm %s563_s4, 64 }
 0x20f   :  { %p462_p7 = scmp.ne.s32.totalorder %s563_s4, %s461_s21  ;;  %p465_p8 = scmp.lt.u32.totalorder %s461_s21, %s563_s4 }
 0x211   :  { %p467_p9 = pnand %p465_p8, %p462_p7 }
 0x213   :  { %470 = shalt.err (!%p467_p9)
}
 0x214   :  { %234 = dma.vmem_to_hbm [thread:$0]  %s232_s18, 64, %s563_s4, [#allocation4]  }
 0x215   :  { %475 = dma.done.wait [#allocation4], 64  }
 0x216   :  { %476 = vsyncadd [#allocation4], 4294967232 }
 0x217   :  { %238 = vsyncpa [#allocation3], 1 }
 0x218   :  { %239 = vsyncpa [#allocation6], 1 }
 0x219   :  { %240 = vsyncpa [#allocation4], 1 }

</bundles_post_ra>
